<compile_context>
chip_gen: v6e
topology: v6e:2x2x1
jax: 0.10.0
libtpu: 0.0.40
codegen_flags: <defaults>
</compile_context>

<pallas_src>
import functools
import math

import jax
import jax.numpy as jnp
from jax import lax
from jax.experimental import pallas as pl
from jax.experimental.pallas import tpu as pltpu


# ----------------------------- small helpers -----------------------------

def find_multiple(n: int, k: int) -> int:
    if n % k == 0:
        return n
    return n + k - n % k


def _round_up(n: int, k: int) -> int:
    return ((n + k - 1) // k) * k


def _pick_tile(dim_size: int, target: int, step: int) -> int:
    """Tile size (multiple of `step`, <= target-ish). Prefer an exact divisor of
    dim_size; otherwise return the padded size / target and let the caller pad."""
    if dim_size <= target:
        return dim_size if dim_size % step == 0 else _round_up(dim_size, step)
    t = (target // step) * step
    while t >= step:
        if dim_size % t == 0:
            return t
        t -= step
    return (target // step) * step


def precompute_freqs_cis(seq_len: int, n_elem: int, base: float = 10000.0):
    # (seq_len, n_elem//2, 2) with [..., 0]=cos, [..., 1]=sin (matches reference)
    freqs = 1.0 / (base ** (jnp.arange(0, n_elem, 2)[: n_elem // 2].astype(jnp.float32) / n_elem))
    t = jnp.arange(seq_len, dtype=jnp.float32)
    freqs = jnp.outer(t, freqs)
    return jnp.stack([jnp.cos(freqs), jnp.sin(freqs)], axis=-1)


def apply_rotary_emb(x, freqs_cis):
    # x: (B, S, H, hd) (any float dtype); freqs_cis: (S, hd//2, 2). f32 math.
    B, S, H, hd = x.shape
    xr = x.astype(jnp.float32).reshape(B, S, H, hd // 2, 2)
    fc = freqs_cis.reshape(1, S, 1, hd // 2, 2)
    real = xr[..., 0] * fc[..., 0] - xr[..., 1] * fc[..., 1]
    imag = xr[..., 1] * fc[..., 0] + xr[..., 0] * fc[..., 1]
    return jnp.stack([real, imag], axis=-1).reshape(B, S, H, hd)


_DN_NT = (((1,), (1,)), ((), ()))  # contract last dim of x with last dim of (N,K) weight


# ----------------------------- tiled linear (optionally fused residual) -----------------------------

def _linear_kernel(x_ref, w_ref, o_ref, acc_ref):
    @pl.when(pl.program_id(2) == 0)
    def _():
        acc_ref[...] = jnp.zeros_like(acc_ref)

    acc_ref[...] += lax.dot_general(x_ref[...], w_ref[...], _DN_NT,
                                    preferred_element_type=jnp.float32)

    @pl.when(pl.program_id(2) == pl.num_programs(2) - 1)
    def _():
        o_ref[...] = acc_ref[...].astype(o_ref.dtype)


def _linear_res_kernel(x_ref, w_ref, res_ref, o_ref, acc_ref):
    @pl.when(pl.program_id(2) == 0)
    def _():
        acc_ref[...] = jnp.zeros_like(acc_ref)

    acc_ref[...] += lax.dot_general(x_ref[...], w_ref[...], _DN_NT,
                                    preferred_element_type=jnp.float32)

    @pl.when(pl.program_id(2) == pl.num_programs(2) - 1)
    def _():
        o_ref[...] = (acc_ref[...] + res_ref[...].astype(jnp.float32)).astype(o_ref.dtype)


def linear(x2d, w, *, residual=None, out_dtype=jnp.float32,
           tm_target=256, tn_target=256, tk_target=512):
    """y = x2d @ w.T (+ residual); x2d: (M, K), w: (N, K) PyTorch-style."""
    M, K = x2d.shape
    N, Kw = w.shape
    assert K == Kw

    tm = _pick_tile(M, tm_target, step=8)
    tn = _pick_tile(N, tn_target, step=128)
    tk = _pick_tile(K, tk_target, step=128)
    Mp, Np, Kp = _round_up(M, tm), _round_up(N, tn), _round_up(K, tk)

    x = x2d.astype(jnp.bfloat16)
    wq = w.astype(jnp.bfloat16)
    if (Mp, Kp) != (M, K):
        x = jnp.pad(x, ((0, Mp - M), (0, Kp - K)))
    if (Np, Kp) != (N, K):
        wq = jnp.pad(wq, ((0, Np - N), (0, Kp - K)))

    in_specs = [
        pl.BlockSpec((tm, tk), lambda i, j, k: (i, k)),
        pl.BlockSpec((tn, tk), lambda i, j, k: (j, k)),
    ]
    args = [x, wq]
    if residual is not None:
        res = residual.astype(jnp.float32)
        if (Mp, Np) != (M, N):
            res = jnp.pad(res, ((0, Mp - M), (0, Np - N)))
        # block index constant in k -> fetched once per (i, j) output tile
        in_specs.append(pl.BlockSpec((tm, tn), lambda i, j, k: (i, j)))
        args.append(res)
        kernel = _linear_res_kernel
    else:
        kernel = _linear_kernel

    out = pl.pallas_call(
        kernel,
        out_shape=jax.ShapeDtypeStruct((Mp, Np), out_dtype),
        grid=(Mp // tm, Np // tn, Kp // tk),
        in_specs=in_specs,
        out_specs=pl.BlockSpec((tm, tn), lambda i, j, k: (i, j)),
        scratch_shapes=[pltpu.VMEM((tm, tn), jnp.float32)],
        compiler_params=pltpu.CompilerParams(
            dimension_semantics=("parallel", "parallel", "arbitrary")),
    )(*args)

    if (Mp, Np) != (M, N):
        out = out[:M, :N]
    return out


# ----------------------------- fused SwiGLU gate: silu(x@w1.T) * (x@w3.T) -----------------------------

def _ffn_gate_kernel(x_ref, w1_ref, w3_ref, o_ref, acc1_ref, acc3_ref):
    @pl.when(pl.program_id(2) == 0)
    def _():
        acc1_ref[...] = jnp.zeros_like(acc1_ref)
        acc3_ref[...] = jnp.zeros_like(acc3_ref)

    x = x_ref[...]
    acc1_ref[...] += lax.dot_general(x, w1_ref[...], _DN_NT, preferred_element_type=jnp.float32)
    acc3_ref[...] += lax.dot_general(x, w3_ref[...], _DN_NT, preferred_element_type=jnp.float32)

    @pl.when(pl.program_id(2) == pl.num_programs(2) - 1)
    def _():
        a = acc1_ref[...]
        o_ref[...] = (a * jax.nn.sigmoid(a) * acc3_ref[...]).astype(o_ref.dtype)


def ffn_gate(x2d, w1, w3, *, out_dtype=jnp.bfloat16,
             tm_target=256, tn_target=256, tk_target=512):
    M, K = x2d.shape
    N = w1.shape[0]
    tm = _pick_tile(M, tm_target, step=8)
    tn = _pick_tile(N, tn_target, step=128)
    tk = _pick_tile(K, tk_target, step=128)
    Mp, Np, Kp = _round_up(M, tm), _round_up(N, tn), _round_up(K, tk)

    x = x2d.astype(jnp.bfloat16)
    w1q = w1.astype(jnp.bfloat16)
    w3q = w3.astype(jnp.bfloat16)
    if (Mp, Kp) != (M, K):
        x = jnp.pad(x, ((0, Mp - M), (0, Kp - K)))
    if (Np, Kp) != (N, K):
        w1q = jnp.pad(w1q, ((0, Np - N), (0, Kp - K)))
        w3q = jnp.pad(w3q, ((0, Np - N), (0, Kp - K)))

    out = pl.pallas_call(
        _ffn_gate_kernel,
        out_shape=jax.ShapeDtypeStruct((Mp, Np), out_dtype),
        grid=(Mp // tm, Np // tn, Kp // tk),
        in_specs=[
            pl.BlockSpec((tm, tk), lambda i, j, k: (i, k)),
            pl.BlockSpec((tn, tk), lambda i, j, k: (j, k)),
            pl.BlockSpec((tn, tk), lambda i, j, k: (j, k)),
        ],
        out_specs=pl.BlockSpec((tm, tn), lambda i, j, k: (i, j)),
        scratch_shapes=[pltpu.VMEM((tm, tn), jnp.float32),
                        pltpu.VMEM((tm, tn), jnp.float32)],
        compiler_params=pltpu.CompilerParams(
            dimension_semantics=("parallel", "parallel", "arbitrary")),
    )(x, w1q, w3q)

    if (Mp, Np) != (M, N):
        out = out[:M, :N]
    return out


# ----------------------------- RMSNorm (row-tiled) -----------------------------

def _rmsnorm_kernel(x_ref, w_ref, o_ref, *, eps):
    x = x_ref[...].astype(jnp.float32)
    ms = jnp.mean(x * x, axis=-1, keepdims=True)
    o_ref[...] = (x * lax.rsqrt(ms + eps) * w_ref[...].astype(jnp.float32)).astype(o_ref.dtype)


def rmsnorm(x2d, w, eps, *, out_dtype=jnp.float32, tm_target=512):
    M, D = x2d.shape
    tm = _pick_tile(M, tm_target, step=8)
    Mp = _round_up(M, tm)
    x = jnp.pad(x2d, ((0, Mp - M), (0, 0))) if Mp != M else x2d
    out = pl.pallas_call(
        functools.partial(_rmsnorm_kernel, eps=eps),
        out_shape=jax.ShapeDtypeStruct((Mp, D), out_dtype),
        grid=(Mp // tm,),
        in_specs=[
            pl.BlockSpec((tm, D), lambda i: (i, 0)),
            pl.BlockSpec((1, D), lambda i: (0, 0)),
        ],
        out_specs=pl.BlockSpec((tm, D), lambda i: (i, 0)),
        compiler_params=pltpu.CompilerParams(dimension_semantics=("parallel",)),
    )(x, w.reshape(1, D))
    return out[:M] if Mp != M else out


# ----------------------------- flash-style SDPA (non-causal, matches reference) -----------------------------

def _sdpa_kernel(q_ref, k_ref, v_ref, o_ref, m_sc, l_sc, acc_sc, *, scale, kv_len):
    kv_idx = pl.program_id(2)

    @pl.when(kv_idx == 0)
    def _():
        m_sc[...] = jnp.full_like(m_sc, -jnp.inf)
        l_sc[...] = jnp.zeros_like(l_sc)
        acc_sc[...] = jnp.zeros_like(acc_sc)

    q = q_ref[0]      # (tq, hd) bf16
    k = k_ref[0]      # (tkv, hd) bf16
    v = v_ref[0]      # (tkv, hd) bf16
    s = lax.dot_general(q, k, _DN_NT, preferred_element_type=jnp.float32) * scale  # (tq, tkv)

    if kv_len is not None:  # mask zero-padded KV positions (static: only when padded)
        col = kv_idx * k.shape[0] + lax.broadcasted_iota(jnp.int32, s.shape, 1)
        s = jnp.where(col < kv_len, s, -jnp.inf)

    m_prev = m_sc[...]
    m_new = jnp.maximum(m_prev, jnp.max(s, axis=-1, keepdims=True))
    alpha = jnp.exp(m_prev - m_new)
    p = jnp.exp(s - m_new)
    l_sc[...] = alpha * l_sc[...] + jnp.sum(p, axis=-1, keepdims=True)
    acc_sc[...] = alpha * acc_sc[...] + jnp.dot(p.astype(v.dtype), v,
                                                preferred_element_type=jnp.float32)
    m_sc[...] = m_new

    @pl.when(kv_idx == pl.num_programs(2) - 1)
    def _():
        o_ref[0] = (acc_sc[...] * pl.reciprocal(l_sc[...], approx=True)).astype(o_ref.dtype)


def sdpa(q, k, v, scale, *, t_target=256):
    """q, k, v: (BH, S, hd). Full (non-causal) attention, flash-tiled over KV."""
    BH, S, hd = q.shape
    t = _pick_tile(S, t_target, step=8)
    Sp = _round_up(S, t)
    if Sp != S:
        pad = ((0, 0), (0, Sp - S), (0, 0))
        q, k, v = jnp.pad(q, pad), jnp.pad(k, pad), jnp.pad(v, pad)

    q_spec = pl.BlockSpec((1, t, hd), lambda b, i, j: (b, i, 0))
    kv_spec = pl.BlockSpec((1, t, hd), lambda b, i, j: (b, j, 0))
    # TODO(synk): pack two hd=64 heads per block so the output lane dim is 128 (lane-dense stores).
    out = pl.pallas_call(
        functools.partial(_sdpa_kernel, scale=scale, kv_len=(S if Sp != S else None)),
        out_shape=jax.ShapeDtypeStruct((BH, Sp, hd), q.dtype),
        grid=(BH, Sp // t, Sp // t),
        in_specs=[q_spec, kv_spec, kv_spec],
        out_specs=q_spec,
        scratch_shapes=[pltpu.VMEM((t, 1), jnp.float32),
                        pltpu.VMEM((t, 1), jnp.float32),
                        pltpu.VMEM((t, hd), jnp.float32)],
        compiler_params=pltpu.CompilerParams(
            dimension_semantics=("parallel", "parallel", "arbitrary")),
    )(q, k, v)
    return out[:, :S] if Sp != S else out


# ----------------------------- model forward -----------------------------

def block_fwd(lp, x, freqs_cis, cfg):
    B, S, D = x.shape
    M = B * S
    eps = cfg["norm_eps"]
    H, hd = cfg["n_head"], cfg["head_dim"]

    x2 = x.reshape(M, D)                                              # f32 residual stream
    xn = rmsnorm(x2, lp["attention_norm"], eps, out_dtype=jnp.bfloat16)

    qkv = linear(xn, lp["wqkv"], out_dtype=jnp.bfloat16)              # (M, 3D) bf16
    qkv = qkv.reshape(B, S, 3, D)                                     # split axis=2 like reference
    q = qkv[:, :, 0, :].reshape(B, S, H, hd)
    k = qkv[:, :, 1, :].reshape(B, S, H, hd)
    v = qkv[:, :, 2, :].reshape(B, S, H, hd)
    q = apply_rotary_emb(q, freqs_cis).astype(jnp.bfloat16)
    k = apply_rotary_emb(k, freqs_cis).astype(jnp.bfloat16)
    # TODO(synk): fold the (B,S,H,hd)->(B*H,S,hd) head transposes and interleaved-pair RoPE
    # into SDPA/wo BlockSpec index maps + in-kernel pltpu.roll instead of XLA relayouts.
    q, k, v = [t.transpose(0, 2, 1, 3).reshape(B * H, S, hd) for t in (q, k, v)]

    y = sdpa(q, k, v, 1.0 / math.sqrt(hd))                            # (B*H, S, hd) bf16
    y = y.reshape(B, H, S, hd).transpose(0, 2, 1, 3).reshape(M, D)
    h = linear(y, lp["wo"], residual=x2, out_dtype=jnp.float32)       # fused residual add

    hn = rmsnorm(h, lp["ffn_norm"], eps, out_dtype=jnp.bfloat16)
    g = ffn_gate(hn, lp["w1"], lp["w3"])                              # fused silu(w1 x) * (w3 x)
    out = linear(g, lp["w2"], residual=h, out_dtype=jnp.float32)      # fused residual add
    return out.reshape(B, S, D)


def transformer_fwd(params, idx):
    cfg = params["config"]
    B, S = idx.shape
    D = cfg["dim"]
    x = jnp.take(params["tok_embeddings"], idx, axis=0)               # (B, S, D) embedding gather
    # input_pos=None path: positions arange(S), identical across the batch.
    freqs_cis = params["freqs_cis"][:S]                               # (S, hd//2, 2)
    for lp in params["layers"]:
        x = block_fwd(lp, x, freqs_cis, cfg)
    x2 = rmsnorm(x.reshape(B * S, D), params["norm"], cfg["norm_eps"], out_dtype=jnp.bfloat16)
    logits = linear(x2, params["output"], out_dtype=jnp.float32)      # (B*S, vocab)
    return logits.reshape(B, S, -1)


# ----------------------------- deterministic init -----------------------------

def init_params(key, cfg):
    def nrm(k, shape, dtype=jnp.bfloat16):
        return (0.02 * jax.random.normal(k, shape, dtype=jnp.float32)).astype(dtype)

    keys = jax.random.split(key, 2 + cfg["n_layer"])
    params = {
        "config": cfg,
        "tok_embeddings": nrm(keys[0], (cfg["vocab_size"], cfg["dim"]), jnp.float32),
        "output": nrm(keys[1], (cfg["vocab_size"], cfg["dim"])),      # bf16 matmul weight
        "norm": jnp.ones((cfg["dim"],), jnp.float32),
        "freqs_cis": precompute_freqs_cis(cfg["block_size"], cfg["head_dim"], cfg["rope_base"]),
        "layers": [],
    }
    for li in range(cfg["n_layer"]):
        lk = jax.random.split(keys[2 + li], 5)
        params["layers"].append({
            "wqkv": nrm(lk[0], (3 * cfg["n_head"] * cfg["head_dim"], cfg["dim"])),
            "wo": nrm(lk[1], (cfg["dim"], cfg["dim"])),
            "w1": nrm(lk[2], (cfg["intermediate_size"], cfg["dim"])),
            "w3": nrm(lk[3], (cfg["intermediate_size"], cfg["dim"])),
            "w2": nrm(lk[4], (cfg["dim"], cfg["intermediate_size"])),
            "attention_norm": jnp.ones((cfg["dim"],), jnp.float32),
            "ffn_norm": jnp.ones((cfg["dim"],), jnp.float32),
        })
    return params


if __name__ == "__main__":
    # Small config consistent with ModelArgs.__post_init__ rules.
    dim, n_head, n_layer = 128, 2, 2
    cfg = {
        "block_size": 64,
        "vocab_size": 256,
        "n_layer": n_layer,
        "n_head": n_head,
        "dim": dim,
        "head_dim": dim // n_head,                                      # 64
        "intermediate_size": find_multiple(int(2 * 4 * dim / 3), 256),  # 512
        "rope_base": 10000.0,
        "norm_eps": 1e-5,
    }

    key = jax.random.PRNGKey(0)
    pkey, ikey = jax.random.split(key)
    params = init_params(pkey, cfg)

    batch, seq = 2, 8
    idx = jax.random.randint(ikey, (batch, seq), 0, cfg["vocab_size"], dtype=jnp.int32)

    logits = transformer_fwd(params, idx)
    jax.block_until_ready(logits)
    assert logits.shape == (batch, seq, cfg["vocab_size"])
    assert bool(jnp.all(jnp.isfinite(logits)))
    print("KERNEL_OK")
</pallas_src>

<mosaic_0001>
module attributes {stable_mosaic.version = 11 : i64} {
  func.func @_rmsnorm_kernel(%arg0: i32, %arg1: memref<16x128xf32, #tpu.memory_space<vmem>>, %arg2: memref<1x128xf32, #tpu.memory_space<vmem>>, %arg3: memref<16x128xbf16, #tpu.memory_space<vmem>>) attributes {dimension_semantics = [#tpu.dimension_semantics<parallel>], iteration_bounds = array<i64: 1>, scalar_prefetch = 0 : i64, scratch_operands = 0 : i64, tpu.core_type = #tpu.core_type<tc>, window_params = [{transform_indices = @transform_0, window_bounds = array<i64: 16, 128>}, {pipeline_mode = #tpu.pipeline_mode<synchronous>, transform_indices = @transform_1, window_bounds = array<i64: 1, 128>}, {transform_indices = @transform_2, window_bounds = array<i64: 16, 128>}]} {
    %c0 = arith.constant 0 : index
    %c0_0 = arith.constant 0 : index
    %0 = vector.load %arg1[%c0, %c0_0] : memref<16x128xf32, #tpu.memory_space<vmem>>, vector<16x128xf32>
    %1 = arith.mulf %0, %0 : vector<16x128xf32>
    %cst = arith.constant dense<0.000000e+00> : vector<16xf32>
    %2 = vector.multi_reduction <add>, %1, %cst [1] : vector<16x128xf32> to vector<16xf32>
    %3 = vector.shape_cast %2 : vector<16xf32> to vector<16x1xf32>
    %cst_1 = arith.constant 1.280000e+02 : f32
    %4 = vector.broadcast %cst_1 : f32 to vector<16x1xf32>
    %5 = arith.divf %3, %4 : vector<16x1xf32>
    %cst_2 = arith.constant 9.99999974E-6 : f32
    %6 = vector.broadcast %cst_2 : f32 to vector<16x1xf32>
    %7 = arith.addf %5, %6 : vector<16x1xf32>
    %8 = math.rsqrt %7 : vector<16x1xf32>
    %9 = vector.broadcast %8 : vector<16x1xf32> to vector<16x128xf32>
    %10 = arith.mulf %0, %9 : vector<16x128xf32>
    %c0_3 = arith.constant 0 : index
    %c0_4 = arith.constant 0 : index
    %11 = vector.load %arg2[%c0_3, %c0_4] : memref<1x128xf32, #tpu.memory_space<vmem>>, vector<1x128xf32>
    %12 = vector.broadcast %11 : vector<1x128xf32> to vector<16x128xf32>
    %13 = arith.mulf %10, %12 : vector<16x128xf32>
    %14 = arith.truncf %13 : vector<16x128xf32> to vector<16x128xbf16>
    %c0_5 = arith.constant 0 : index
    %c0_6 = arith.constant 0 : index
    %15 = vector.load %arg3[%c0_5, %c0_6] : memref<16x128xbf16, #tpu.memory_space<vmem>>, vector<16x128xbf16>
    tpu.vector_store %arg3[%c0_5, %c0_6], %14 {strides = array<i32>} : memref<16x128xbf16, #tpu.memory_space<vmem>>, vector<16x128xbf16>,
    return
  }
  func.func @transform_0(%arg0: i32) -> (i32, i32) {
    %c0_i32 = arith.constant 0 : i32
    %c0_i32_0 = arith.constant 0 : i32
    return %arg0, %c0_i32 : i32, i32
  }
  func.func @transform_1(%arg0: i32) -> (i32, i32) {
    %c0_i32 = arith.constant 0 : i32
    %c0_i32_0 = arith.constant 0 : i32
    %c0_i32_1 = arith.constant 0 : i32
    return %c0_i32, %c0_i32_0 : i32, i32
  }
  func.func @transform_2(%arg0: i32) -> (i32, i32) {
    %c0_i32 = arith.constant 0 : i32
    %c0_i32_0 = arith.constant 0 : i32
    return %arg0, %c0_i32 : i32, i32
  }
}

</mosaic_0001>

<bundles_post_ra>
// kernel: tpu_custom_call.1
= control target key start
LH: loop header
LB: loop body
LE: loop exit
PB: predicated region body
PF: predicated region fallthrough
CT: control target
= control target key end

     0   :  { %7 = vsyncpa [#allocation3], 0  ;;  %s173_s0 = inlined_call_operand.hbm [shape: f32[16,128], index: 0, kind: input, shape index: {}]   ;;  %s174_s1 = inlined_call_operand.vmem [shape: f32[1,128], index: 1, kind: input, shape index: {}]   ;;  %s175_s2 = inlined_call_operand.hbm [shape: bf16[16,128], index: 2, kind: output, shape index: {}]  }
   0x1   :  { %8 = vsyncpa [#allocation4], 0  ;;  %s143_s9 = smov [#allocation2]  }
   0x2   :  { %s14_s10 = sshll.u32 %s143_s9, 4  ;;  %s15_s10 = int_to_ptr.vmem [resolvable:$true] %s14_s10 }
   0x3   :  { %s107_s11 = scalar_lea.vmem %s15_s10, 256  ;;  %p112_p1 = scmp.lt.s32.totalorder %s15_s10, %s15_s10 }
   0x4   :  { %p108_p0 = scmp.ne.s32.totalorder %s15_s10, %s107_s11  ;;  %p113_p2 = scmp.lt.s32.totalorder %s107_s11, %s107_s11 }
   0x6   :  { %p114_p3 = por %p113_p2, %p112_p1 }
   0x8   :  { %p115_p4 = pnand %p114_p3, %p108_p0 }
   0xa   :  { %118 = shalt.err (!%p115_p4)
}
   0xb   :  { %s144_s12 = smov 128   ;;  %s145_s13 = smov 8  }
   0xc   :  { %20 = dma.hbm_to_vmem [thread:$0]  %s173_s0, 256, %s15_s10, [#allocation3], %s144_s12, %s144_s12, %s145_s13  }
   0xd   :  { %139 = dma.done.wait [#allocation3], 256  }
   0xe   :  { %140 = vsyncadd [#allocation3], 4294967040  ;;  %v26_v0 = vld [vmem:[#allocation2] sm:$0xff]  ;;  %v27_v1 = vld [vmem:[#allocation2 + $0x8] sm:$0xff]  ;;  %s146_s17 = smov [#allocation5]  }
   0xf   :  { %v28_v2 = vmul.f32 %v26_v0, %v26_v0  ;;  %v29_v3 = vmul.f32 %v27_v1, %v27_v1  ;;  %v79_v13 = vld [vmem:[%s174_s1] ss:$0 sm:$0xff]  ;;  %s67_s18 = sshll.u32 %s146_s17, 4  ;;  %s68_s18 = int_to_ptr.vmem [resolvable:$true] %s67_s18 }
  0x10   :  { %s119_s19 = scalar_lea.vmem %s68_s18, 128  ;;  %p124_p6 = scmp.lt.s32.totalorder %s68_s18, %s68_s18 }
  0x11   :  { %30 = vadd.xlane.f32.xlu0 %v28_v2  ;;  %p120_p5 = scmp.ne.s32.totalorder %s68_s18, %s119_s19  ;;  %p125_p7 = scmp.lt.s32.totalorder %s119_s19, %s119_s19 }
  0x13   :  { %p126_p8 = por %p125_p7, %p124_p6 }
  0x15   :  { %32 = vadd.xlane.f32.xlu0 %v29_v3  ;;  %p127_p9 = pnand %p126_p8, %p120_p5 }
  0x9a   :  { %v31_v4 = vpop.xlane.xlu0 %30 }
  0x9b   :  { %v35_v5 = vmul.f32 0.0078125, %v31_v4 }
  0x9d   :  { %v37_v6 = vadd.f32 1e-05, %v35_v5 }
  0x9e   :  { %v33_v7 = vpop.xlane.xlu0 %32 }
  0x9f   :  { %95 = vrsqrt.f32 %v37_v6  ;;  %v36_v8 = vmul.f32 0.0078125, %v33_v7 }
  0xa1   :  { %v38_v9 = vadd.f32 1e-05, %v36_v8 }
  0xa3   :  { %97 = vrsqrt.f32 %v38_v9 }
  0xac   :  { %v96_v10 = vpop.eup %95 }
  0xad   :  { %v41_v11 = vmul.f32 %v96_v10, %v26_v0 }
  0xaf   :  { %v50_v15 = vmul.f32 %v79_v13, %v41_v11 }
  0xb0   :  { %v98_v12 = vpop.eup %97 }
  0xb1   :  { %v42_v14 = vmul.f32 %v98_v12, %v27_v1 }
  0xb3   :  { %v51_v16 = vmul.f32 %v79_v13, %v42_v14 }
  0xb5   :  { %v87_v17 = vpack.c.bf16 %v51_v16, %v50_v15 }
  0xb7   :  { %88 = vst [vmem:[#allocation5] sm:$0xff] %v87_v17  }
  0xb8   :  { %130 = shalt.err (!%p127_p9)
}
  0xb9   :  { %s147_s20 = smov 64   ;;  %s148_s21 = smov 4  }
  0xba   :  { %73 = dma.vmem_to_hbm [thread:$0]  %s68_s18, 128, %s175_s2, [#allocation4], %s147_s20, %s147_s20, %s148_s21  }
  0xbb   :  { %141 = dma.done.wait [#allocation4], 128  }
  0xbc   :  { %142 = vsyncadd [#allocation4], 4294967168 }
  0xbd   :  { %77 = vsyncpa [#allocation3], 1 }
  0xbe   :  { %78 = vsyncpa [#allocation4], 1 }

</bundles_post_ra>
